<compile_context>
chip_gen: v5e
topology: v5e:2x2
jax: 0.10.0
libtpu: 0.0.40
codegen_flags: <defaults>
</compile_context>

<pallas_src>
import functools

import jax
import jax.numpy as jnp
from jax import lax
from jax.experimental import pallas as pl
from jax.experimental.pallas import tpu as pltpu


def _mmd_kernel(src_ref, tgt_ref, loss_ref, *, kernel_mul, kernel_num):
    B, D = src_ref.shape
    n = 2 * B

    s = src_ref[...].astype(jnp.float32)
    t = tgt_ref[...].astype(jnp.float32)

    # Row squared norms per block (no (2B, D) concatenated copy in VMEM).
    s_sq = jnp.sum(s * s, axis=1, keepdims=True)  # (B, 1)
    t_sq = jnp.sum(t * t, axis=1, keepdims=True)  # (B, 1)

    def sq_dists(a, b, a_sq, b_sq, zero_diag):
        # ||a_i - b_j||^2 = ||a_i||^2 + ||b_j||^2 - 2 a_i.b_j  via MXU gram
        # (default precision: single-pass bf16 MXU, f32 accumulate).
        g = lax.dot_general(a, b,
                            dimension_numbers=(((1,), (1,)), ((), ())),
                            preferred_element_type=jnp.float32)
        d = jnp.maximum(a_sq + jnp.transpose(b_sq) - 2.0 * g, 0.0)
        if zero_diag:
            # True self-distance is exactly 0 (matches the difference-based ref).
            row = lax.broadcasted_iota(jnp.int32, d.shape, 0)
            col = lax.broadcasted_iota(jnp.int32, d.shape, 1)
            d = jnp.where(row == col, jnp.float32(0.0), d)
        return d

    l2_xx = sq_dists(s, s, s_sq, s_sq, True)    # (B, B)
    l2_yy = sq_dists(t, t, t_sq, t_sq, True)    # (B, B)
    l2_xy = sq_dists(s, t, s_sq, t_sq, False)   # (B, B); YX block is its transpose

    # bandwidth = sum over the full (2B, 2B) L2 matrix / (n^2 - n);
    # the YX block mirrors XY, so it contributes the same sum.
    l2_sum = jnp.sum(l2_xx) + jnp.sum(l2_yy) + 2.0 * jnp.sum(l2_xy)
    bandwidth = l2_sum / float(n * n - n)
    bandwidth = bandwidth / (kernel_mul ** (kernel_num // 2))
    inv_bw = 1.0 / bandwidth  # one scalar reciprocal, hoisted out of the loop

    # loss = mean(XX + YY - XY - YX) = (sum kXX + sum kYY - 2 sum kXY) / B^2.
    # Accumulate the three quadrant sums as scalars; kmat is never built.
    sum_xx = jnp.float32(0.0)
    sum_yy = jnp.float32(0.0)
    sum_xy = jnp.float32(0.0)
    for i in range(kernel_num):
        c_i = inv_bw * (-1.0 / (kernel_mul ** i))   # scalar, negation folded in
        sum_xx = sum_xx + jnp.sum(jnp.exp(l2_xx * c_i))
        sum_yy = sum_yy + jnp.sum(jnp.exp(l2_yy * c_i))
        sum_xy = sum_xy + jnp.sum(jnp.exp(l2_xy * c_i))

    loss_ref[0, 0] = (sum_xx + sum_yy - 2.0 * sum_xy) / float(B * B)


def mmd(source, target, kernel_mul=2.0, kernel_num=5):
    """source, target: (B, D) float32 feature matrices. Returns scalar MMD loss."""
    assert source.shape == target.shape and source.ndim == 2
    kernel = functools.partial(_mmd_kernel,
                               kernel_mul=float(kernel_mul),
                               kernel_num=int(kernel_num))
    out = pl.pallas_call(
        kernel,
        out_shape=jax.ShapeDtypeStruct((1, 1), jnp.float32),
        in_specs=[pl.BlockSpec(memory_space=pltpu.MemorySpace.VMEM),
                  pl.BlockSpec(memory_space=pltpu.MemorySpace.VMEM)],
        out_specs=pl.BlockSpec(memory_space=pltpu.MemorySpace.SMEM),
        compiler_params=pltpu.CompilerParams(
            vmem_limit_bytes=48 * 1024 * 1024),
    )(source.astype(jnp.float32), target.astype(jnp.float32))
    return out[0, 0]


def _mmd_ref(source, target, kernel_mul=2.0, kernel_num=5):
    """Pure-JAX reference mirroring the PyTorch code exactly."""
    B = source.shape[0]
    n = 2 * B
    total = jnp.concatenate([source, target], axis=0)
    diff = total[None, :, :] - total[:, None, :]
    l2 = jnp.sum(diff * diff, axis=2)
    bandwidth = jnp.sum(l2) / (n * n - n)
    bandwidth = bandwidth / (kernel_mul ** (kernel_num // 2))
    kmat = sum(jnp.exp(-l2 / (bandwidth * kernel_mul ** i)) for i in range(kernel_num))
    XX = kmat[:B, :B]
    YY = kmat[B:, B:]
    XY = kmat[:B, B:]
    YX = kmat[B:, :B]
    return jnp.mean(XX + YY - XY - YX)


if __name__ == "__main__":
    key = jax.random.PRNGKey(0)
    k1, k2 = jax.random.split(key)
    B, D = 8, 32
    source = jax.random.normal(k1, (B, D), dtype=jnp.float32)
    target = jax.random.normal(k2, (B, D), dtype=jnp.float32) + 0.5

    loss = jax.block_until_ready(mmd(source, target))
    loss_ref = jax.block_until_ready(_mmd_ref(source, target))

    assert jnp.isfinite(loss), "non-finite loss"
    # Default-precision (bf16-pass) gram vs exact-difference f32 reference:
    # allow a small absolute/relative slack.
    tol = 1e-2 * max(1.0, abs(float(loss_ref)))
    assert abs(float(loss) - float(loss_ref)) < tol, (float(loss), float(loss_ref))
    print("KERNEL_OK")
</pallas_src>

<mosaic_0001>
module attributes {stable_mosaic.version = 11 : i64} {
  func.func @_mmd_kernel(%arg0: memref<8x32xf32, #tpu.memory_space<vmem>>, %arg1: memref<8x32xf32, #tpu.memory_space<vmem>>, %arg2: memref<1x1xf32, #tpu.memory_space<smem>>) attributes {dimension_semantics = [], scalar_prefetch = 0 : i64, scratch_operands = 0 : i64, tpu.core_type = #tpu.core_type<tc>} {
    %c0 = arith.constant 0 : index
    %c0_0 = arith.constant 0 : index
    %0 = vector.load %arg0[%c0, %c0_0] : memref<8x32xf32, #tpu.memory_space<vmem>>, vector<8x32xf32>
    %c0_1 = arith.constant 0 : index
    %c0_2 = arith.constant 0 : index
    %1 = vector.load %arg1[%c0_1, %c0_2] : memref<8x32xf32, #tpu.memory_space<vmem>>, vector<8x32xf32>
    %2 = arith.mulf %0, %0 : vector<8x32xf32>
    %cst = arith.constant dense<0.000000e+00> : vector<8xf32>
    %3 = vector.multi_reduction <add>, %2, %cst [1] : vector<8x32xf32> to vector<8xf32>
    %4 = vector.shape_cast %3 : vector<8xf32> to vector<8x1xf32>
    %5 = arith.mulf %1, %1 : vector<8x32xf32>
    %cst_3 = arith.constant dense<0.000000e+00> : vector<8xf32>
    %6 = vector.multi_reduction <add>, %5, %cst_3 [1] : vector<8x32xf32> to vector<8xf32>
    %7 = vector.shape_cast %6 : vector<8xf32> to vector<8x1xf32>
    %cst_4 = arith.constant dense<0.000000e+00> : vector<8x8xf32>
    %8 = tpu.matmul %0, %0, %cst_4 {dimension_numbers = #tpu.dot_dimension_numbers<[1], [1], [0], [0], [0, 0, 1, 0], [], []>} : vector<8x32xf32>, vector<8x32xf32>, vector<8x8xf32> -> vector<8x8xf32>
    %9 = tpu.transpose %4, [1, 0] : vector<8x1xf32> -> vector<1x8xf32>
    %10 = vector.broadcast %4 : vector<8x1xf32> to vector<8x8xf32>
    %11 = vector.broadcast %9 : vector<1x8xf32> to vector<8x8xf32>
    %12 = arith.addf %10, %11 : vector<8x8xf32>
    %cst_5 = arith.constant 2.000000e+00 : f32
    %13 = vector.broadcast %cst_5 : f32 to vector<8x8xf32>
    %14 = arith.mulf %13, %8 : vector<8x8xf32>
    %15 = arith.subf %12, %14 : vector<8x8xf32>
    %cst_6 = arith.constant 0.000000e+00 : f32
    %16 = vector.broadcast %cst_6 : f32 to vector<8x8xf32>
    %17 = arith.maximumf %15, %16 : vector<8x8xf32>
    %18 = tpu.iota {dimensions = array<i32: 0>} : vector<8x8xi32>
    %19 = tpu.iota {dimensions = array<i32: 1>} : vector<8x8xi32>
    %20 = arith.cmpi eq, %18, %19 : vector<8x8xi32>
    %cst_7 = arith.constant 0.000000e+00 : f32
    %21 = vector.broadcast %cst_7 : f32 to vector<8x8xf32>
    %22 = arith.select %20, %21, %17 : vector<8x8xi1>, vector<8x8xf32>
    %cst_8 = arith.constant dense<0.000000e+00> : vector<8x8xf32>
    %23 = tpu.matmul %1, %1, %cst_8 {dimension_numbers = #tpu.dot_dimension_numbers<[1], [1], [0], [0], [0, 0, 1, 0], [], []>} : vector<8x32xf32>, vector<8x32xf32>, vector<8x8xf32> -> vector<8x8xf32>
    %24 = tpu.transpose %7, [1, 0] : vector<8x1xf32> -> vector<1x8xf32>
    %25 = vector.broadcast %7 : vector<8x1xf32> to vector<8x8xf32>
    %26 = vector.broadcast %24 : vector<1x8xf32> to vector<8x8xf32>
    %27 = arith.addf %25, %26 : vector<8x8xf32>
    %cst_9 = arith.constant 2.000000e+00 : f32
    %28 = vector.broadcast %cst_9 : f32 to vector<8x8xf32>
    %29 = arith.mulf %28, %23 : vector<8x8xf32>
    %30 = arith.subf %27, %29 : vector<8x8xf32>
    %cst_10 = arith.constant 0.000000e+00 : f32
    %31 = vector.broadcast %cst_10 : f32 to vector<8x8xf32>
    %32 = arith.maximumf %30, %31 : vector<8x8xf32>
    %33 = tpu.iota {dimensions = array<i32: 0>} : vector<8x8xi32>
    %34 = tpu.iota {dimensions = array<i32: 1>} : vector<8x8xi32>
    %35 = arith.cmpi eq, %33, %34 : vector<8x8xi32>
    %cst_11 = arith.constant 0.000000e+00 : f32
    %36 = vector.broadcast %cst_11 : f32 to vector<8x8xf32>
    %37 = arith.select %35, %36, %32 : vector<8x8xi1>, vector<8x8xf32>
    %cst_12 = arith.constant dense<0.000000e+00> : vector<8x8xf32>
    %38 = tpu.matmul %0, %1, %cst_12 {dimension_numbers = #tpu.dot_dimension_numbers<[1], [1], [0], [0], [0, 0, 1, 0], [], []>} : vector<8x32xf32>, vector<8x32xf32>, vector<8x8xf32> -> vector<8x8xf32>
    %39 = tpu.transpose %7, [1, 0] : vector<8x1xf32> -> vector<1x8xf32>
    %40 = vector.broadcast %4 : vector<8x1xf32> to vector<8x8xf32>
    %41 = vector.broadcast %39 : vector<1x8xf32> to vector<8x8xf32>
    %42 = arith.addf %40, %41 : vector<8x8xf32>
    %cst_13 = arith.constant 2.000000e+00 : f32
    %43 = vector.broadcast %cst_13 : f32 to vector<8x8xf32>
    %44 = arith.mulf %43, %38 : vector<8x8xf32>
    %45 = arith.subf %42, %44 : vector<8x8xf32>
    %cst_14 = arith.constant 0.000000e+00 : f32
    %46 = vector.broadcast %cst_14 : f32 to vector<8x8xf32>
    %47 = arith.maximumf %45, %46 : vector<8x8xf32>
    %48 = vector.shape_cast %22 : vector<8x8xf32> to vector<1x8x8xf32>
    %cst_15 = arith.constant dense<0.000000e+00> : vector<1xf32>
    %49 = vector.multi_reduction <add>, %48, %cst_15 [1, 2] : vector<1x8x8xf32> to vector<1xf32>
    %50 = vector.shape_cast %49 : vector<1xf32> to vector<1x1x1xf32>
    %51 = vector.extract %50[0, 0, 0] : f32 from vector<1x1x1xf32>
    %52 = vector.shape_cast %37 : vector<8x8xf32> to vector<1x8x8xf32>
    %cst_16 = arith.constant dense<0.000000e+00> : vector<1xf32>
    %53 = vector.multi_reduction <add>, %52, %cst_16 [1, 2] : vector<1x8x8xf32> to vector<1xf32>
    %54 = vector.shape_cast %53 : vector<1xf32> to vector<1x1x1xf32>
    %55 = vector.extract %54[0, 0, 0] : f32 from vector<1x1x1xf32>
    %56 = arith.addf %51, %55 : f32
    %57 = vector.shape_cast %47 : vector<8x8xf32> to vector<1x8x8xf32>
    %cst_17 = arith.constant dense<0.000000e+00> : vector<1xf32>
    %58 = vector.multi_reduction <add>, %57, %cst_17 [1, 2] : vector<1x8x8xf32> to vector<1xf32>
    %59 = vector.shape_cast %58 : vector<1xf32> to vector<1x1x1xf32>
    %60 = vector.extract %59[0, 0, 0] : f32 from vector<1x1x1xf32>
    %cst_18 = arith.constant 2.000000e+00 : f32
    %61 = arith.mulf %cst_18, %60 : f32
    %62 = arith.addf %56, %61 : f32
    %cst_19 = arith.constant 2.400000e+02 : f32
    %63 = arith.divf %62, %cst_19 : f32
    %cst_20 = arith.constant 4.000000e+00 : f32
    %64 = arith.divf %63, %cst_20 : f32
    %cst_21 = arith.constant 1.000000e+00 : f32
    %65 = arith.divf %cst_21, %64 : f32
    %cst_22 = arith.constant -1.000000e+00 : f32
    %66 = arith.mulf %65, %cst_22 : f32
    %67 = vector.broadcast %66 : f32 to vector<8x8xf32>
    %68 = arith.mulf %22, %67 : vector<8x8xf32>
    %69 = math.exp %68 : vector<8x8xf32>
    %70 = vector.shape_cast %69 : vector<8x8xf32> to vector<1x8x8xf32>
    %cst_23 = arith.constant dense<0.000000e+00> : vector<1xf32>
    %71 = vector.multi_reduction <add>, %70, %cst_23 [1, 2] : vector<1x8x8xf32> to vector<1xf32>
    %72 = vector.shape_cast %71 : vector<1xf32> to vector<1x1x1xf32>
    %73 = vector.extract %72[0, 0, 0] : f32 from vector<1x1x1xf32>
    %cst_24 = arith.constant 0.000000e+00 : f32
    %74 = arith.addf %cst_24, %73 : f32
    %75 = vector.broadcast %66 : f32 to vector<8x8xf32>
    %76 = arith.mulf %37, %75 : vector<8x8xf32>
    %77 = math.exp %76 : vector<8x8xf32>
    %78 = vector.shape_cast %77 : vector<8x8xf32> to vector<1x8x8xf32>
    %cst_25 = arith.constant dense<0.000000e+00> : vector<1xf32>
    %79 = vector.multi_reduction <add>, %78, %cst_25 [1, 2] : vector<1x8x8xf32> to vector<1xf32>
    %80 = vector.shape_cast %79 : vector<1xf32> to vector<1x1x1xf32>
    %81 = vector.extract %80[0, 0, 0] : f32 from vector<1x1x1xf32>
    %cst_26 = arith.constant 0.000000e+00 : f32
    %82 = arith.addf %cst_26, %81 : f32
    %83 = vector.broadcast %66 : f32 to vector<8x8xf32>
    %84 = arith.mulf %47, %83 : vector<8x8xf32>
    %85 = math.exp %84 : vector<8x8xf32>
    %86 = vector.shape_cast %85 : vector<8x8xf32> to vector<1x8x8xf32>
    %cst_27 = arith.constant dense<0.000000e+00> : vector<1xf32>
    %87 = vector.multi_reduction <add>, %86, %cst_27 [1, 2] : vector<1x8x8xf32> to vector<1xf32>
    %88 = vector.shape_cast %87 : vector<1xf32> to vector<1x1x1xf32>
    %89 = vector.extract %88[0, 0, 0] : f32 from vector<1x1x1xf32>
    %cst_28 = arith.constant 0.000000e+00 : f32
    %90 = arith.addf %cst_28, %89 : f32
    %cst_29 = arith.constant -5.000000e-01 : f32
    %91 = arith.mulf %65, %cst_29 : f32
    %92 = vector.broadcast %91 : f32 to vector<8x8xf32>
    %93 = arith.mulf %22, %92 : vector<8x8xf32>
    %94 = math.exp %93 : vector<8x8xf32>
    %95 = vector.shape_cast %94 : vector<8x8xf32> to vector<1x8x8xf32>
    %cst_30 = arith.constant dense<0.000000e+00> : vector<1xf32>
    %96 = vector.multi_reduction <add>, %95, %cst_30 [1, 2] : vector<1x8x8xf32> to vector<1xf32>
    %97 = vector.shape_cast %96 : vector<1xf32> to vector<1x1x1xf32>
    %98 = vector.extract %97[0, 0, 0] : f32 from vector<1x1x1xf32>
    %99 = arith.addf %74, %98 : f32
    %100 = vector.broadcast %91 : f32 to vector<8x8xf32>
    %101 = arith.mulf %37, %100 : vector<8x8xf32>
    %102 = math.exp %101 : vector<8x8xf32>
    %103 = vector.shape_cast %102 : vector<8x8xf32> to vector<1x8x8xf32>
    %cst_31 = arith.constant dense<0.000000e+00> : vector<1xf32>
    %104 = vector.multi_reduction <add>, %103, %cst_31 [1, 2] : vector<1x8x8xf32> to vector<1xf32>
    %105 = vector.shape_cast %104 : vector<1xf32> to vector<1x1x1xf32>
    %106 = vector.extract %105[0, 0, 0] : f32 from vector<1x1x1xf32>
    %107 = arith.addf %82, %106 : f32
    %108 = vector.broadcast %91 : f32 to vector<8x8xf32>
    %109 = arith.mulf %47, %108 : vector<8x8xf32>
    %110 = math.exp %109 : vector<8x8xf32>
    %111 = vector.shape_cast %110 : vector<8x8xf32> to vector<1x8x8xf32>
    %cst_32 = arith.constant dense<0.000000e+00> : vector<1xf32>
    %112 = vector.multi_reduction <add>, %111, %cst_32 [1, 2] : vector<1x8x8xf32> to vector<1xf32>
    %113 = vector.shape_cast %112 : vector<1xf32> to vector<1x1x1xf32>
    %114 = vector.extract %113[0, 0, 0] : f32 from vector<1x1x1xf32>
    %115 = arith.addf %90, %114 : f32
    %cst_33 = arith.constant -2.500000e-01 : f32
    %116 = arith.mulf %65, %cst_33 : f32
    %117 = vector.broadcast %116 : f32 to vector<8x8xf32>
    %118 = arith.mulf %22, %117 : vector<8x8xf32>
    %119 = math.exp %118 : vector<8x8xf32>
    %120 = vector.shape_cast %119 : vector<8x8xf32> to vector<1x8x8xf32>
    %cst_34 = arith.constant dense<0.000000e+00> : vector<1xf32>
    %121 = vector.multi_reduction <add>, %120, %cst_34 [1, 2] : vector<1x8x8xf32> to vector<1xf32>
    %122 = vector.shape_cast %121 : vector<1xf32> to vector<1x1x1xf32>
    %123 = vector.extract %122[0, 0, 0] : f32 from vector<1x1x1xf32>
    %124 = arith.addf %99, %123 : f32
    %125 = vector.broadcast %116 : f32 to vector<8x8xf32>
    %126 = arith.mulf %37, %125 : vector<8x8xf32>
    %127 = math.exp %126 : vector<8x8xf32>
    %128 = vector.shape_cast %127 : vector<8x8xf32> to vector<1x8x8xf32>
    %cst_35 = arith.constant dense<0.000000e+00> : vector<1xf32>
    %129 = vector.multi_reduction <add>, %128, %cst_35 [1, 2] : vector<1x8x8xf32> to vector<1xf32>
    %130 = vector.shape_cast %129 : vector<1xf32> to vector<1x1x1xf32>
    %131 = vector.extract %130[0, 0, 0] : f32 from vector<1x1x1xf32>
    %132 = arith.addf %107, %131 : f32
    %133 = vector.broadcast %116 : f32 to vector<8x8xf32>
    %134 = arith.mulf %47, %133 : vector<8x8xf32>
    %135 = math.exp %134 : vector<8x8xf32>
    %136 = vector.shape_cast %135 : vector<8x8xf32> to vector<1x8x8xf32>
    %cst_36 = arith.constant dense<0.000000e+00> : vector<1xf32>
    %137 = vector.multi_reduction <add>, %136, %cst_36 [1, 2] : vector<1x8x8xf32> to vector<1xf32>
    %138 = vector.shape_cast %137 : vector<1xf32> to vector<1x1x1xf32>
    %139 = vector.extract %138[0, 0, 0] : f32 from vector<1x1x1xf32>
    %140 = arith.addf %115, %139 : f32
    %cst_37 = arith.constant -1.250000e-01 : f32
    %141 = arith.mulf %65, %cst_37 : f32
    %142 = vector.broadcast %141 : f32 to vector<8x8xf32>
    %143 = arith.mulf %22, %142 : vector<8x8xf32>
    %144 = math.exp %143 : vector<8x8xf32>
    %145 = vector.shape_cast %144 : vector<8x8xf32> to vector<1x8x8xf32>
    %cst_38 = arith.constant dense<0.000000e+00> : vector<1xf32>
    %146 = vector.multi_reduction <add>, %145, %cst_38 [1, 2] : vector<1x8x8xf32> to vector<1xf32>
    %147 = vector.shape_cast %146 : vector<1xf32> to vector<1x1x1xf32>
    %148 = vector.extract %147[0, 0, 0] : f32 from vector<1x1x1xf32>
    %149 = arith.addf %124, %148 : f32
    %150 = vector.broadcast %141 : f32 to vector<8x8xf32>
    %151 = arith.mulf %37, %150 : vector<8x8xf32>
    %152 = math.exp %151 : vector<8x8xf32>
    %153 = vector.shape_cast %152 : vector<8x8xf32> to vector<1x8x8xf32>
    %cst_39 = arith.constant dense<0.000000e+00> : vector<1xf32>
    %154 = vector.multi_reduction <add>, %153, %cst_39 [1, 2] : vector<1x8x8xf32> to vector<1xf32>
    %155 = vector.shape_cast %154 : vector<1xf32> to vector<1x1x1xf32>
    %156 = vector.extract %155[0, 0, 0] : f32 from vector<1x1x1xf32>
    %157 = arith.addf %132, %156 : f32
    %158 = vector.broadcast %141 : f32 to vector<8x8xf32>
    %159 = arith.mulf %47, %158 : vector<8x8xf32>
    %160 = math.exp %159 : vector<8x8xf32>
    %161 = vector.shape_cast %160 : vector<8x8xf32> to vector<1x8x8xf32>
    %cst_40 = arith.constant dense<0.000000e+00> : vector<1xf32>
    %162 = vector.multi_reduction <add>, %161, %cst_40 [1, 2] : vector<1x8x8xf32> to vector<1xf32>
    %163 = vector.shape_cast %162 : vector<1xf32> to vector<1x1x1xf32>
    %164 = vector.extract %163[0, 0, 0] : f32 from vector<1x1x1xf32>
    %165 = arith.addf %140, %164 : f32
    %cst_41 = arith.constant -6.250000e-02 : f32
    %166 = arith.mulf %65, %cst_41 : f32
    %167 = vector.broadcast %166 : f32 to vector<8x8xf32>
    %168 = arith.mulf %22, %167 : vector<8x8xf32>
    %169 = math.exp %168 : vector<8x8xf32>
    %170 = vector.shape_cast %169 : vector<8x8xf32> to vector<1x8x8xf32>
    %cst_42 = arith.constant dense<0.000000e+00> : vector<1xf32>
    %171 = vector.multi_reduction <add>, %170, %cst_42 [1, 2] : vector<1x8x8xf32> to vector<1xf32>
    %172 = vector.shape_cast %171 : vector<1xf32> to vector<1x1x1xf32>
    %173 = vector.extract %172[0, 0, 0] : f32 from vector<1x1x1xf32>
    %174 = arith.addf %149, %173 : f32
    %175 = vector.broadcast %166 : f32 to vector<8x8xf32>
    %176 = arith.mulf %37, %175 : vector<8x8xf32>
    %177 = math.exp %176 : vector<8x8xf32>
    %178 = vector.shape_cast %177 : vector<8x8xf32> to vector<1x8x8xf32>
    %cst_43 = arith.constant dense<0.000000e+00> : vector<1xf32>
    %179 = vector.multi_reduction <add>, %178, %cst_43 [1, 2] : vector<1x8x8xf32> to vector<1xf32>
    %180 = vector.shape_cast %179 : vector<1xf32> to vector<1x1x1xf32>
    %181 = vector.extract %180[0, 0, 0] : f32 from vector<1x1x1xf32>
    %182 = arith.addf %157, %181 : f32
    %183 = vector.broadcast %166 : f32 to vector<8x8xf32>
    %184 = arith.mulf %47, %183 : vector<8x8xf32>
    %185 = math.exp %184 : vector<8x8xf32>
    %186 = vector.shape_cast %185 : vector<8x8xf32> to vector<1x8x8xf32>
    %cst_44 = arith.constant dense<0.000000e+00> : vector<1xf32>
    %187 = vector.multi_reduction <add>, %186, %cst_44 [1, 2] : vector<1x8x8xf32> to vector<1xf32>
    %188 = vector.shape_cast %187 : vector<1xf32> to vector<1x1x1xf32>
    %189 = vector.extract %188[0, 0, 0] : f32 from vector<1x1x1xf32>
    %190 = arith.addf %165, %189 : f32
    %191 = arith.addf %174, %182 : f32
    %cst_45 = arith.constant 2.000000e+00 : f32
    %192 = arith.mulf %cst_45, %190 : f32
    %193 = arith.subf %191, %192 : f32
    %cst_46 = arith.constant 6.400000e+01 : f32
    %194 = arith.divf %193, %cst_46 : f32
    %c0_47 = arith.constant 0 : index
    %c0_48 = arith.constant 0 : index
    %195 = memref.load %arg2[%c0_47, %c0_48] : memref<1x1xf32, #tpu.memory_space<smem>>
    memref.store %194, %arg2[%c0_47, %c0_48] : memref<1x1xf32, #tpu.memory_space<smem>>
    return
  }
}

</mosaic_0001>

<bundles_post_ra>
// kernel: tpu_custom_call.1
= control target key start
LH: loop header
LB: loop body
LE: loop exit
PB: predicated region body
PF: predicated region fallthrough
CT: control target
= control target key end

     0   :  { %7 = vsyncpa [#allocation3], 0  ;;  %s763_s0 = inlined_call_operand.hbm [shape: f32[8,32], index: 0, kind: input, shape index: {}]   ;;  %s764_s1 = inlined_call_operand.hbm [shape: f32[8,32], index: 1, kind: input, shape index: {}]   ;;  %s765_s2 = inlined_call_operand.hbm [shape: f32[1,1], index: 2, kind: output, shape index: {}]  }
   0x1   :  { %8 = vsyncpa [#allocation6], 0 }
   0x2   :  { %9 = vsyncpa [#allocation4], 0  ;;  %s15_s11 = sshll.u32 %s763_s0, 4  ;;  %s682_s12 = smov [#allocation2]   ;;  %s16_s11 = int_to_ptr.hbm [resolvable:$true] %s15_s11 }
   0x3   :  { %s17_s13 = sshll.u32 %s682_s12, 4  ;;  %s26_s16 = sshll.u32 %s764_s1, 4  ;;  %s18_s13 = int_to_ptr.vmem [resolvable:$true] %s17_s13  ;;  %s27_s16 = int_to_ptr.hbm [resolvable:$true] %s26_s16 }
   0x4   :  { %20 = dma.hbm_to_vmem [thread:$0]  %s16_s11, 128, %s18_s13, [#allocation3]  }
   0x5   :  { %s683_s17 = smov [#allocation5]  }
   0x6   :  { %s28_s18 = sshll.u32 %s683_s17, 4  ;;  %s29_s18 = int_to_ptr.vmem [resolvable:$true] %s28_s18 }
   0x7   :  { %31 = dma.hbm_to_vmem [thread:$0]  %s27_s16, 128, %s29_s18, [#allocation6]  }
   0x8   :  { %676 = dma.done.wait [#allocation3], 128  }
   0x9   :  { %677 = vsyncadd [#allocation3], 4294967168 }
   0xa   :  { %678 = dma.done.wait [#allocation6], 128  }
   0xb   :  { %679 = vsyncadd [#allocation6], 4294967168  ;;  %v40_v0 = vld [vmem:[#allocation2] sm:$0xff]  ;;  %vm43_vm0 = vcmask 261120   ;;  %v41_v1 = vld [vmem:[#allocation5] sm:$0xff]  ;;  %v111_v9 = vlaneseq  ;;  %vm202_vm2 = vcmask 64512  }
   0xc   :  { %v42_v2 = vmul.f32 %v40_v0, %v40_v0  ;;  %521 = vmatpush.xpose.msk.msra.mxu0 %vm43_vm0, %v40_v0  ;;  %525 = vmatpush.xpose.msk.msra.mxu2 %vm43_vm0, %v41_v1  ;;  %v47_v4 = vmul.f32 %v41_v1, %v41_v1  ;;  %v684_v35 = vmov 240.0   ;;  %v685_v36 = vmov 4.0  }
   0xd   :  { %523 = vmatpush.xpose.msk.msra.mxu1 %vm43_vm0, %v41_v1  ;;  %v112_v13 = vshrl.u32 %v111_v9, 7  ;;  %v114_v14 = vand.u32 127, %v111_v9  ;;  %578 = vrcp.f32 %v684_v35 }
   0xe   :  { %v44_v3 = vsel %vm43_vm0, %v42_v2, 0.0  ;;  %v48_v5 = vsel %vm43_vm0, %v47_v4, 0.0  ;;  %580 = vrcp.f32 %v685_v36 }
   0xf   :  { %45 = vadd.xlane.f32.xlu0 %v44_v3  ;;  %522 = vmatmul.msk.f32.vlgmr.msra.gmra.mxu0 %vm43_vm0, %v40_v0  ;;  %vm115_vm1 = vcmp.eq.s32.totalorder %v112_v13, %v114_v14 }
  0x10   :  { %526 = vmatmul.msk.f32.vlgmr.msra.gmra.mxu2 %vm43_vm0, %v40_v0  ;;  %524 = vmatmul.msk.f32.vlgmr.msra.gmra.mxu1 %vm43_vm0, %v41_v1 }
  0x13   :  { %v579_v38 = vpop.eup %578 }
  0x14   :  { %v581_v40 = vpop.eup %580  ;;  %v237_v42 = vmul.f32 240.0, %v579_v38  ;;  %vm241_vm3 = vweird.f32 %v579_v38 }
  0x15   :  { %v246_v44 = vmul.f32 4.0, %v581_v40  ;;  %vm250_vm4 = vweird.f32 %v581_v40 }
  0x16   :  { %v238_v49 = vsub.f32 1.0, %v237_v42 }
  0x17   :  { %49 = vadd.xlane.f32.xlu0 %v48_v5  ;;  %v247_v52 = vsub.f32 1.0, %v246_v44 }
  0x18   :  { %v239_v57 = vmul.f32 %v579_v38, %v238_v49 }
  0x19   :  { %v248_v59 = vmul.f32 %v581_v40, %v247_v52 }
  0x1a   :  { %v240_v63 = vadd.f32 %v579_v38, %v239_v57 }
  0x1b   :  { %v249_v1 = vadd.f32 %v581_v40, %v248_v59 }
  0x1c   :  { %v242_v4 = vsel %vm241_vm3, %v579_v38, %v240_v63 }
  0x1d   :  { %v251_v5 = vsel %vm250_vm4, %v581_v40, %v249_v1 }
  0x82   :  { %v46_v6 = vpop.xlane.xlu0 %45 }
  0x83   :  { %74 = vxpose.xlu1.b32.start.end [1/1] (short) (narrow) %v46_v6, 8 }
  0x8a   :  { %v50_v7 = vpop.xlane.xlu0 %49 }
  0x8b   :  { %140 = vxpose.xlu1.b32.start.end [1/1] (short) (narrow) %v50_v7, 8 }
  0x8c   :  { %v71_v8 = vpop.f32.mrf.mxu0 }
  0x8d   :  { %v108_v12 = vmul.f32 2.0, %v71_v8  ;;  %v137_v17 = vpop.f32.mrf.mxu1 }
  0x8e   :  { %v174_v23 = vmul.f32 2.0, %v137_v17 }
  0x93   :  { %v195_v18 = vpop.f32.mrf.mxu2 }
  0x94   :  { %v199_v24 = vmul.f32 2.0, %v195_v18 }
 0x127   :  { %v90_v10 = vpop.trf.xlu1 }
 0x128   :  { %v106_v11 = vperm.slane %v90_v10, 0 }
 0x12a   :  { %v107_v15 = vadd.f32 %v106_v11, %v46_v6 }
 0x12c   :  { %v109_v16 = vsub.f32 %v107_v15, %v108_v12 }
 0x12e   :  { %v110_v19 = vmax.f32 %v109_v16, 0.0 }
 0x12f   :  { %v156_v20 = vpop.trf.xlu1 }
 0x130   :  { %v710_v21 = vsel %vm115_vm1, 0.0, %v110_v19  ;;  %v172_v22 = vperm.slane %v156_v20, 0 }
 0x131   :  { %v203_v25 = vsel %vm202_vm2, %v710_v21, 0.0 }
 0x132   :  { %v173_v26 = vadd.f32 %v172_v22, %v50_v7  ;;  %v198_v27 = vadd.f32 %v172_v22, %v46_v6  ;;  %204 = vadd.xlane.f32.xlu2 %v203_v25 }
 0x134   :  { %v175_v28 = vsub.f32 %v173_v26, %v174_v23  ;;  %v200_v29 = vsub.f32 %v198_v27, %v199_v24 }
 0x136   :  { %v176_v30 = vmax.f32 %v175_v28, 0.0  ;;  %v714_v31 = vmax.f32 %v200_v29, 0.0 }
 0x138   :  { %v717_v32 = vsel %vm115_vm1, 0.0, %v176_v30  ;;  %v224_v33 = vsel %vm202_vm2, %v714_v31, 0.0 }
 0x139   :  { %225 = vadd.xlane.f32.xlu0 %v224_v33  ;;  %v213_v34 = vsel %vm202_vm2, %v717_v32, 0.0 }
 0x13a   :  { %214 = vadd.xlane.f32.xlu2 %v213_v34 }
 0x1a5   :  { %v205_v37 = vpop.xlane.xlu2 %204 }
 0x1a6   :  { %v206_v39 = vrot.slane %v205_v37, 4 }
 0x1a8   :  { %v207_v41 = vadd.f32 %v206_v39, %v205_v37 }
 0x1aa   :  { %v208_v43 = vrot.slane %v207_v41, 2 }
 0x1ac   :  { %v226_v45 = vpop.xlane.xlu0 %225  ;;  %v209_v46 = vadd.f32 %v208_v43, %v207_v41 }
 0x1ad   :  { %v227_v47 = vrot.slane %v226_v45, 4  ;;  %v215_v48 = vpop.xlane.xlu2 %214 }
 0x1ae   :  { %v216_v50 = vrot.slane %v215_v48, 4  ;;  %v210_v51 = vrot.slane %v209_v46, 1 }
 0x1af   :  { %v228_v53 = vadd.f32 %v227_v47, %v226_v45 }
 0x1b0   :  { %v217_v54 = vadd.f32 %v216_v50, %v215_v48  ;;  %v211_v55 = vadd.f32 %v210_v51, %v209_v46 }
 0x1b1   :  { %v229_v56 = vrot.slane %v228_v53, 2 }
 0x1b2   :  { %v218_v58 = vrot.slane %v217_v54, 2  ;;  %527 = vpush %v211_v55 }
 0x1b3   :  { %v230_v60 = vadd.f32 %v229_v56, %v228_v53 }
 0x1b4   :  { %v219_v61 = vadd.f32 %v218_v58, %v217_v54 }
 0x1b5   :  { %v231_v62 = vrot.slane %v230_v60, 1 }
 0x1b6   :  { %v220_v0 = vrot.slane %v219_v61, 1 }
 0x1b7   :  { %v232_v2 = vadd.f32 %v231_v62, %v230_v60 }
 0x1b8   :  { %v221_v3 = vadd.f32 %v220_v0, %v219_v61 }
 0x1ba   :  { %529 = vpush %v221_v3 }
 0x1bb   :  { %531 = vpush %v232_v2 }
 0x1bc   :  { %533 = vpush %v242_v4 }
 0x1bd   :  { %535 = vpush %v251_v5 }
 0x1e3   :  { %s528_s0 = spop %527 }
 0x1eb   :  { %s530_s1 = spop %529 }
 0x1ec   :  { %s223_s19 = sadd.f32 %s530_s1, %s528_s0  ;;  %s532_s20 = spop %531 }
 0x1ed   :  { %s234_s21 = smul.f32 2.0, %s532_s20  ;;  %s534_s22 = spop %533 }
 0x1ee   :  { %s536_s24 = spop %535 }
 0x1ef   :  { %s235_s23 = sadd.f32 %s234_s21, %s223_s19 }
 0x1f1   :  { %s244_s25 = smul.f32 %s534_s22, %s235_s23 }
 0x1f3   :  { %s253_s26 = smul.f32 %s536_s24, %s244_s25 }
 0x1f5   :  { %v254_v6 = vstv %s253_s26 }
 0x1f6   :  { %582 = vrcp.f32 %v254_v6  ;;  %v266_v10 = vand.u32 2147483648, %v254_v6  ;;  %v264_v12 = vand.u32 2147483647, %v254_v6  ;;  %vm260_vm6 = vweird.f32 %v254_v6 }
 0x1f8   :  { %v267_v14 = vor.u32 1.1754944e-38, %v266_v10  ;;  %vm265_vm8 = vcmp.eq.f32.partialorder %v264_v12, 8.507059e+37 }
 0x1fc   :  { %v583_v7 = vpop.eup %582 }
 0x1fd   :  { %v256_v8 = vmul.f32 %v583_v7, %v254_v6  ;;  %vm261_vm5 = vweird.f32 %v583_v7 }
 0x1fe   :  { %vm262_vm7 = vmor %vm260_vm6, %vm261_vm5 }
 0x1ff   :  { %v257_v9 = vsub.f32 1.0, %v256_v8 }
 0x201   :  { %v258_v11 = vmul.f32 %v583_v7, %v257_v9 }
 0x203   :  { %v259_v13 = vadd.f32 %v583_v7, %v258_v11 }
 0x205   :  { %v263_v15 = vsel %vm262_vm7, %v583_v7, %v259_v13 }
 0x206   :  { %v268_v16 = vsel %vm265_vm8, %v267_v14, %v263_v15 }
 0x207   :  { %537 = vpush %v268_v16 }
 0x238   :  { %s723_s27 = spop %537 }
 0x239   :  { %s270_s28 = smul.f32 -1.0, %s723_s27 }
 0x23a   :  { %s314_s29 = smul.f32 -0.5, %s723_s27 }
 0x23b   :  { %v271_v17 = vstv %s270_s28  ;;  %s358_s30 = smul.f32 -0.25, %s723_s27 }
 0x23c   :  { %v315_v18 = vstv %s314_s29  ;;  %v300_v19 = vmul.f32 %v271_v17, %v714_v31  ;;  %v286_v20 = vmul.f32 %v271_v17, %v717_v32  ;;  %v272_v22 = vmul.f32 %v271_v17, %v710_v21  ;;  %s402_s3 = smul.f32 -0.125, %s723_s27 }
 0x23d   :  { %v330_v26 = vmul.f32 %v315_v18, %v717_v32  ;;  %v316_v27 = vmul.f32 %v315_v18, %v710_v21  ;;  %v359_v29 = vstv %s358_s30  ;;  %v344_v37 = vmul.f32 %v315_v18, %v714_v31  ;;  %s446_s4 = smul.f32 -0.0625, %s723_s27 }
 0x23e   :  { %v301_v23 = vmul.f32 1.442695, %v300_v19  ;;  %v287_v24 = vmul.f32 1.442695, %v286_v20  ;;  %v273_v25 = vmul.f32 1.442695, %v272_v22  ;;  %v360_v34 = vmul.f32 %v359_v29, %v710_v21 }
 0x23f   :  { %v331_v28 = vmul.f32 1.442695, %v330_v26  ;;  %v317_v30 = vmul.f32 1.442695, %v316_v27  ;;  %v345_v42 = vmul.f32 1.442695, %v344_v37  ;;  %v388_v45 = vmul.f32 %v359_v29, %v714_v31 }
 0x240   :  { %584 = vpow2.f32 %v301_v23  ;;  %v361_v41 = vmul.f32 1.442695, %v360_v34  ;;  %v374_v47 = vmul.f32 %v359_v29, %v717_v32  ;;  %v403_v50 = vstv %s402_s3 }
 0x241   :  { %586 = vpow2.f32 %v287_v24  ;;  %v389_v49 = vmul.f32 1.442695, %v388_v45  ;;  %v418_v54 = vmul.f32 %v403_v50, %v717_v32  ;;  %v404_v56 = vmul.f32 %v403_v50, %v710_v21 }
 0x242   :  { %588 = vpow2.f32 %v273_v25  ;;  %v375_v51 = vmul.f32 1.442695, %v374_v47  ;;  %v447_v59 = vstv %s446_s4  ;;  %v432_v1 = vmul.f32 %v403_v50, %v714_v31 }
 0x243   :  { %590 = vpow2.f32 %v331_v28  ;;  %v419_v58 = vmul.f32 1.442695, %v418_v54  ;;  %v405_v60 = vmul.f32 1.442695, %v404_v56  ;;  %v448_v63 = vmul.f32 %v447_v59, %v710_v21 }
 0x244   :  { %592 = vpow2.f32 %v317_v30  ;;  %v433_v4 = vmul.f32 1.442695, %v432_v1  ;;  %v476_v7 = vmul.f32 %v447_v59, %v714_v31  ;;  %v462_v21 = vmul.f32 %v447_v59, %v717_v32 }
 0x245   :  { %594 = vpow2.f32 %v361_v41  ;;  %v449_v3 = vmul.f32 1.442695, %v448_v63 }
 0x246   :  { %v585_v33 = vpop.eup %584  ;;  %596 = vpow2.f32 %v345_v42  ;;  %v477_v10 = vmul.f32 1.442695, %v476_v7  ;;  %v463_v11 = vmul.f32 1.442695, %v462_v21 }
 0x247   :  { %v587_v35 = vpop.eup %586  ;;  %v303_v36 = vsel %vm202_vm2, %v585_v33, 0.0  ;;  %598 = vpow2.f32 %v389_v49 }
 0x248   :  { %v589_v38 = vpop.eup %588  ;;  %304 = vadd.xlane.f32.xlu0 %v303_v36  ;;  %v289_v39 = vsel %vm202_vm2, %v587_v35, 0.0  ;;  %600 = vpow2.f32 %v375_v51 }
 0x249   :  { %290 = vadd.xlane.f32.xlu2 %v289_v39  ;;  %v275_v40 = vsel %vm202_vm2, %v589_v38, 0.0  ;;  %v591_v43 = vpop.eup %590  ;;  %602 = vpow2.f32 %v419_v58 }
 0x24a   :  { %276 = vadd.xlane.f32.xlu1 %v275_v40  ;;  %v593_v44 = vpop.eup %592  ;;  %v333_v46 = vsel %vm202_vm2, %v591_v43, 0.0  ;;  %604 = vpow2.f32 %v405_v60 }
 0x24b   :  { %v319_v48 = vsel %vm202_vm2, %v593_v44, 0.0  ;;  %v595_v52 = vpop.eup %594  ;;  %606 = vpow2.f32 %v449_v3 }
 0x24c   :  { %v597_v53 = vpop.eup %596  ;;  %v363_v55 = vsel %vm202_vm2, %v595_v52, 0.0  ;;  %608 = vpow2.f32 %v433_v4 }
 0x24d   :  { %v347_v57 = vsel %vm202_vm2, %v597_v53, 0.0  ;;  %v599_v61 = vpop.eup %598  ;;  %610 = vpow2.f32 %v477_v10 }
 0x24e   :  { %v601_v62 = vpop.eup %600  ;;  %v391_v0 = vsel %vm202_vm2, %v599_v61, 0.0  ;;  %612 = vpow2.f32 %v463_v11 }
 0x24f   :  { %v377_v2 = vsel %vm202_vm2, %v601_v62, 0.0  ;;  %v603_v5 = vpop.eup %602 }
 0x250   :  { %334 = vadd.xlane.f32.xlu0 %v333_v46  ;;  %v605_v6 = vpop.eup %604  ;;  %v421_v8 = vsel %vm202_vm2, %v603_v5, 0.0 }
 0x251   :  { %320 = vadd.xlane.f32.xlu2 %v319_v48  ;;  %v407_v9 = vsel %vm202_vm2, %v605_v6, 0.0  ;;  %v607_v12 = vpop.eup %606 }
 0x252   :  { %v609_v13 = vpop.eup %608  ;;  %v451_v14 = vsel %vm202_vm2, %v607_v12, 0.0 }
 0x253   :  { %v435_v31 = vsel %vm202_vm2, %v609_v13, 0.0  ;;  %v611_v15 = vpop.eup %610 }
 0x254   :  { %v613_v16 = vpop.eup %612  ;;  %v479_v32 = vsel %vm202_vm2, %v611_v15, 0.0 }
 0x255   :  { %v465_v17 = vsel %vm202_vm2, %v613_v16, 0.0 }
 0x258   :  { %364 = vadd.xlane.f32.xlu0 %v363_v55 }
 0x259   :  { %348 = vadd.xlane.f32.xlu2 %v347_v57 }
 0x260   :  { %392 = vadd.xlane.f32.xlu0 %v391_v0 }
 0x261   :  { %378 = vadd.xlane.f32.xlu2 %v377_v2 }
 0x268   :  { %422 = vadd.xlane.f32.xlu0 %v421_v8 }
 0x269   :  { %408 = vadd.xlane.f32.xlu2 %v407_v9 }
 0x270   :  { %452 = vadd.xlane.f32.xlu0 %v451_v14 }
 0x271   :  { %436 = vadd.xlane.f32.xlu2 %v435_v31 }
 0x278   :  { %480 = vadd.xlane.f32.xlu0 %v479_v32 }
 0x279   :  { %466 = vadd.xlane.f32.xlu2 %v465_v17 }
 0x2bb   :  { %v305_v18 = vpop.xlane.xlu0 %304 }
 0x2bc   :  { %v306_v19 = vrot.slane %v305_v18, 4  ;;  %v291_v20 = vpop.xlane.xlu2 %290 }
 0x2bd   :  { %v292_v22 = vrot.slane %v291_v20, 4  ;;  %v277_v23 = vpop.xlane.xlu1 %276 }
 0x2be   :  { %v307_v24 = vadd.f32 %v306_v19, %v305_v18  ;;  %v278_v25 = vrot.slane %v277_v23, 4 }
 0x2bf   :  { %v293_v26 = vadd.f32 %v292_v22, %v291_v20 }
 0x2c0   :  { %v308_v27 = vrot.slane %v307_v24, 2  ;;  %v279_v28 = vadd.f32 %v278_v25, %v277_v23 }
 0x2c1   :  { %v294_v29 = vrot.slane %v293_v26, 2 }
 0x2c2   :  { %v280_v30 = vrot.slane %v279_v28, 2  ;;  %v309_v33 = vadd.f32 %v308_v27, %v307_v24  ;;  %v686_v24 = vmov 64.0  }
 0x2c3   :  { %v335_v34 = vpop.xlane.xlu0 %334  ;;  %v295_v35 = vadd.f32 %v294_v29, %v293_v26  ;;  %614 = vrcp.f32 %v686_v24 }
 0x2c4   :  { %v281_v36 = vadd.f32 %v280_v30, %v279_v28  ;;  %v336_v37 = vrot.slane %v335_v34, 4  ;;  %v321_v38 = vpop.xlane.xlu2 %320  ;;  %v310_v39 = vrot.slane %v309_v33, 1 }
 0x2c5   :  { %v322_v40 = vrot.slane %v321_v38, 4  ;;  %v296_v41 = vrot.slane %v295_v35, 1 }
 0x2c6   :  { %v337_v42 = vadd.f32 %v336_v37, %v335_v34  ;;  %v282_v43 = vrot.slane %v281_v36, 1  ;;  %v311_v48 = vadd.f32 %v310_v39, %v309_v33 }
 0x2c7   :  { %v323_v44 = vadd.f32 %v322_v40, %v321_v38  ;;  %v297_v45 = vadd.f32 %v296_v41, %v295_v35 }
 0x2c8   :  { %v338_v46 = vrot.slane %v337_v42, 2  ;;  %v283_v47 = vadd.f32 %v282_v43, %v281_v36 }
 0x2c9   :  { %v324_v49 = vrot.slane %v323_v44, 2  ;;  %v615_v35 = vpop.eup %614 }
 0x2ca   :  { %539 = vpush %v283_v47  ;;  %v339_v50 = vadd.f32 %v338_v46, %v337_v42  ;;  %v494_v43 = vmul.f32 64.0, %v615_v35  ;;  %vm498_vm9 = vweird.f32 %v615_v35 }
 0x2cb   :  { %541 = vpush %v297_v45  ;;  %v365_v51 = vpop.xlane.xlu0 %364  ;;  %v325_v52 = vadd.f32 %v324_v49, %v323_v44 }
 0x2cc   :  { %543 = vpush %v311_v48  ;;  %v366_v53 = vrot.slane %v365_v51, 4  ;;  %v349_v54 = vpop.xlane.xlu2 %348  ;;  %v340_v55 = vrot.slane %v339_v50, 1 }
 0x2cd   :  { %v350_v56 = vrot.slane %v349_v54, 4  ;;  %v326_v57 = vrot.slane %v325_v52, 1 }
 0x2ce   :  { %v367_v58 = vadd.f32 %v366_v53, %v365_v51  ;;  %v341_v59 = vadd.f32 %v340_v55, %v339_v50  ;;  %v495_v51 = vsub.f32 1.0, %v494_v43 }
 0x2cf   :  { %v351_v60 = vadd.f32 %v350_v56, %v349_v54  ;;  %v327_v61 = vadd.f32 %v326_v57, %v325_v52 }
 0x2d0   :  { %v368_v62 = vrot.slane %v367_v58, 2 }
 0x2d1   :  { %v352_v63 = vrot.slane %v351_v60, 2  ;;  %545 = vpush %v327_v61 }
 0x2d2   :  { %547 = vpush %v341_v59  ;;  %v369_v0 = vadd.f32 %v368_v62, %v367_v58  ;;  %v496_v59 = vmul.f32 %v615_v35, %v495_v51 }
 0x2d3   :  { %v393_v1 = vpop.xlane.xlu0 %392  ;;  %v353_v2 = vadd.f32 %v352_v63, %v351_v60 }
 0x2d4   :  { %v394_v3 = vrot.slane %v393_v1, 4  ;;  %v379_v4 = vpop.xlane.xlu2 %378  ;;  %v370_v5 = vrot.slane %v369_v0, 1 }
 0x2d5   :  { %v380_v6 = vrot.slane %v379_v4, 4  ;;  %v354_v7 = vrot.slane %v353_v2, 1 }
 0x2d6   :  { %v395_v8 = vadd.f32 %v394_v3, %v393_v1  ;;  %v371_v21 = vadd.f32 %v370_v5, %v369_v0  ;;  %v497_v0 = vadd.f32 %v615_v35, %v496_v59 }
 0x2d7   :  { %v381_v9 = vadd.f32 %v380_v6, %v379_v4  ;;  %v355_v10 = vadd.f32 %v354_v7, %v353_v2 }
 0x2d8   :  { %v396_v11 = vrot.slane %v395_v8, 2  ;;  %v499_v4 = vsel %vm498_vm9, %v615_v35, %v497_v0 }
 0x2d9   :  { %v382_v12 = vrot.slane %v381_v9, 2  ;;  %549 = vpush %v355_v10 }
 0x2da   :  { %551 = vpush %v371_v21  ;;  %v397_v13 = vadd.f32 %v396_v11, %v395_v8 }
 0x2db   :  { %v423_v14 = vpop.xlane.xlu0 %422  ;;  %v383_v31 = vadd.f32 %v382_v12, %v381_v9 }
 0x2dc   :  { %v424_v15 = vrot.slane %v423_v14, 4  ;;  %v409_v16 = vpop.xlane.xlu2 %408  ;;  %v398_v32 = vrot.slane %v397_v13, 1 }
 0x2dd   :  { %v410_v17 = vrot.slane %v409_v16, 4  ;;  %v384_v18 = vrot.slane %v383_v31, 1 }
 0x2de   :  { %v425_v19 = vadd.f32 %v424_v15, %v423_v14  ;;  %v399_v20 = vadd.f32 %v398_v32, %v397_v13 }
 0x2df   :  { %v411_v22 = vadd.f32 %v410_v17, %v409_v16  ;;  %v385_v23 = vadd.f32 %v384_v18, %v383_v31 }
 0x2e0   :  { %v426_v25 = vrot.slane %v425_v19, 2 }
 0x2e1   :  { %v412_v26 = vrot.slane %v411_v22, 2  ;;  %553 = vpush %v385_v23 }
 0x2e2   :  { %555 = vpush %v399_v20  ;;  %v427_v27 = vadd.f32 %v426_v25, %v425_v19 }
 0x2e3   :  { %v453_v28 = vpop.xlane.xlu0 %452  ;;  %v413_v29 = vadd.f32 %v412_v26, %v411_v22 }
 0x2e4   :  { %v454_v30 = vrot.slane %v453_v28, 4  ;;  %v437_v33 = vpop.xlane.xlu2 %436  ;;  %v428_v34 = vrot.slane %v427_v27, 1 }
 0x2e5   :  { %v438_v36 = vrot.slane %v437_v33, 4  ;;  %v414_v37 = vrot.slane %v413_v29, 1 }
 0x2e6   :  { %v455_v38 = vadd.f32 %v454_v30, %v453_v28  ;;  %v429_v39 = vadd.f32 %v428_v34, %v427_v27 }
 0x2e7   :  { %v439_v40 = vadd.f32 %v438_v36, %v437_v33  ;;  %v415_v41 = vadd.f32 %v414_v37, %v413_v29 }
 0x2e8   :  { %v456_v42 = vrot.slane %v455_v38, 2 }
 0x2e9   :  { %v440_v44 = vrot.slane %v439_v40, 2  ;;  %557 = vpush %v415_v41 }
 0x2ea   :  { %559 = vpush %v429_v39  ;;  %v457_v45 = vadd.f32 %v456_v42, %v455_v38 }
 0x2eb   :  { %v481_v46 = vpop.xlane.xlu0 %480  ;;  %v441_v47 = vadd.f32 %v440_v44, %v439_v40 }
 0x2ec   :  { %v482_v48 = vrot.slane %v481_v46, 4  ;;  %v467_v49 = vpop.xlane.xlu2 %466  ;;  %v458_v50 = vrot.slane %v457_v45, 1 }
 0x2ed   :  { %v468_v52 = vrot.slane %v467_v49, 4  ;;  %v442_v53 = vrot.slane %v441_v47, 1 }
 0x2ee   :  { %v483_v54 = vadd.f32 %v482_v48, %v481_v46  ;;  %v459_v55 = vadd.f32 %v458_v50, %v457_v45 }
 0x2ef   :  { %v469_v56 = vadd.f32 %v468_v52, %v467_v49  ;;  %v443_v57 = vadd.f32 %v442_v53, %v441_v47 }
 0x2f0   :  { %v484_v58 = vrot.slane %v483_v54, 2 }
 0x2f1   :  { %v470_v60 = vrot.slane %v469_v56, 2  ;;  %561 = vpush %v443_v57 }
 0x2f2   :  { %v485_v61 = vadd.f32 %v484_v58, %v483_v54  ;;  %563 = vpush %v459_v55 }
 0x2f3   :  { %v471_v62 = vadd.f32 %v470_v60, %v469_v56 }
 0x2f4   :  { %v486_v63 = vrot.slane %v485_v61, 1 }
 0x2f5   :  { %v472_v1 = vrot.slane %v471_v62, 1 }
 0x2f6   :  { %v487_v2 = vadd.f32 %v486_v63, %v485_v61 }
 0x2f7   :  { %v473_v3 = vadd.f32 %v472_v1, %v471_v62 }
 0x2f9   :  { %565 = vpush %v473_v3 }
 0x2fa   :  { %567 = vpush %v487_v2 }
 0x2fb   :  { %569 = vpush %v499_v4  ;;  %s540_s5 = spop %539 }
 0x2fc   :  { %s542_s6 = spop %541 }
 0x2fd   :  { %s544_s7 = spop %543 }
 0x302   :  { %s546_s8 = spop %545 }
 0x303   :  { %s548_s9 = spop %547  ;;  %s329_s13 = sadd.f32 %s546_s8, %s540_s5 }
 0x304   :  { %s343_s15 = sadd.f32 %s548_s9, %s542_s6 }
 0x30a   :  { %s550_s10 = spop %549 }
 0x30b   :  { %s552_s11 = spop %551  ;;  %s357_s17 = sadd.f32 %s550_s10, %s544_s7 }
 0x30c   :  { %s373_s18 = sadd.f32 %s552_s11, %s329_s13  ;;  %s509_s7 = sshll.u32 %s765_s2, 4  ;;  %s510_s7 = int_to_ptr.hbm [resolvable:$true] %s509_s7 }
 0x30d   :  { %s687_s10 = smov [#allocation7]  }
 0x312   :  { %s554_s12 = spop %553 }
 0x313   :  { %s556_s14 = spop %555  ;;  %s387_s1 = sadd.f32 %s554_s12, %s343_s15 }
 0x314   :  { %s401_s20 = sadd.f32 %s556_s14, %s357_s17 }
 0x31a   :  { %s558_s16 = spop %557 }
 0x31b   :  { %s560_s0 = spop %559  ;;  %s417_s21 = sadd.f32 %s558_s16, %s373_s18 }
 0x31c   :  { %s431_s23 = sadd.f32 %s560_s0, %s387_s1 }
 0x322   :  { %s562_s19 = spop %561 }
 0x323   :  { %s564_s22 = spop %563  ;;  %s445_s24 = sadd.f32 %s562_s19, %s401_s20 }
 0x324   :  { %s461_s25 = sadd.f32 %s564_s22, %s417_s21 }
 0x32a   :  { %s566_s26 = spop %565 }
 0x32b   :  { %s475_s27 = sadd.f32 %s566_s26, %s431_s23  ;;  %s568_s28 = spop %567 }
 0x32c   :  { %s489_s29 = sadd.f32 %s568_s28, %s445_s24  ;;  %s570_s4 = spop %569 }
 0x32d   :  { %s490_s30 = sadd.f32 %s475_s27, %s461_s25 }
 0x32e   :  { %s491_s3 = smul.f32 2.0, %s489_s29 }
 0x330   :  { %s492_s8 = ssub.f32 %s490_s30, %s491_s3 }
 0x332   :  { %s501_s9 = smul.f32 %s570_s4, %s492_s8 }
 0x334   :  { %503 = sst [smem:[#allocation7]] %s501_s9 }
 0x335   :  { %512 = dma.smem_to_hbm %s687_s10, 16, %s510_s7, [#allocation4]  }
 0x336   :  { %680 = dma.done.wait [#allocation4], 16  }
 0x337   :  { %681 = vsyncadd [#allocation4], 4294967280 }
 0x338   :  { %517 = sfence }
 0x339   :  { %518 = vsyncpa [#allocation3], 1 }
 0x33a   :  { %519 = vsyncpa [#allocation6], 1 }
 0x33b   :  { %520 = vsyncpa [#allocation4], 1 }

</bundles_post_ra>
